<compile_context>
chip_gen: v6e
topology: v6e:2x2x1
jax: 0.10.0
libtpu: 0.0.40
codegen_flags: <defaults>
</compile_context>

<pallas_src>
import jax
import jax.numpy as jnp
from jax.experimental import pallas as pl
from jax.experimental.pallas import tpu as pltpu


def _round_up(x, m):
    return ((x + m - 1) // m) * m


def _smooth_l1_kernel(pred_ref, tgt_ref, w_ref, out_ref, num_ref, den_ref):
    i = pl.program_id(0)

    @pl.when(i == 0)
    def _init():
        num_ref[...] = jnp.zeros_like(num_ref)
        den_ref[...] = jnp.zeros_like(den_ref)

    p = pred_ref[...].astype(jnp.float32)
    t = tgt_ref[...].astype(jnp.float32)
    w = w_ref[...].astype(jnp.float32)

    diff = jnp.abs(p - t)
    in_loss = jnp.where(diff < 1.0, diff * diff, diff - 0.5)

    num_ref[...] += jnp.sum(in_loss * w)
    den_ref[...] += jnp.sum(w)

    @pl.when(i == pl.num_programs(0) - 1)
    def _finalize():
        out_ref[...] = num_ref[...] / (den_ref[...] + 0.001)


def smooth_l1_loss(preds, targets, weights, *, block_rows=256, block_cols=1024):
    """preds/targets: [b, n, 2]; weights: [b, n, 1] (PyTorch layout)."""
    assert preds.shape == targets.shape and preds.shape[-1] == 2
    assert weights.shape == preds.shape[:-1] + (1,)
    assert block_cols % 128 == 0 and block_rows % 8 == 0

    n_elems = preds.size  # b * n * 2

    # Free reshapes: keep natural contiguous order, no transpose.
    pf = preds.reshape(-1)
    tf = targets.reshape(-1)
    # Per-coordinate weight: w_rep[j] = w[j // 2].  One cheap XLA op on the
    # small weights array (an element interleave is not a free reshape).
    wf = jnp.repeat(weights.reshape(-1), 2, axis=0)

    # Lane-dense 2D view, zero-padded so the row tile divides evenly.
    cols = block_cols
    rows = _round_up(n_elems, cols) // cols
    tr = min(block_rows, _round_up(rows, 8))
    rows_pad = _round_up(rows, tr)
    pad = rows_pad * cols - n_elems
    if pad:
        pf = jnp.pad(pf, (0, pad))
        tf = jnp.pad(tf, (0, pad))
        wf = jnp.pad(wf, (0, pad))
    p2 = pf.reshape(rows_pad, cols)
    t2 = tf.reshape(rows_pad, cols)
    w2 = wf.reshape(rows_pad, cols)

    grid = (rows_pad // tr,)
    tile_spec = pl.BlockSpec((tr, cols), lambda i: (i, 0))

    out = pl.pallas_call(
        _smooth_l1_kernel,
        out_shape=jax.ShapeDtypeStruct((1, 1), jnp.float32),
        grid_spec=pltpu.PrefetchScalarGridSpec(
            num_scalar_prefetch=0,
            grid=grid,
            in_specs=[tile_spec, tile_spec, tile_spec],
            out_specs=pl.BlockSpec((1, 1), lambda i: (0, 0)),
            scratch_shapes=[pltpu.VMEM((1, 1), jnp.float32),
                            pltpu.VMEM((1, 1), jnp.float32)],
        ),
        compiler_params=pltpu.CompilerParams(
            dimension_semantics=("arbitrary",)),
    )(p2, t2, w2)
    return out[0, 0]


def _smooth_l1_loss_ref(pred, targets, weights):
    """Pure-JAX reference mirroring the PyTorch code exactly."""
    diff = jnp.abs(pred - targets)
    in_loss = jnp.where(diff < 1.0, diff ** 2, diff - 0.5)
    w = jnp.tile(weights, (1, 1, in_loss.shape[2]))
    return jnp.sum(in_loss * w) / (jnp.sum(w) + 0.001)


if __name__ == "__main__":
    key = jax.random.PRNGKey(0)
    k1, k2, k3, k4, k5, k6 = jax.random.split(key, 6)

    # Small case (module layout: [b, n, 2] / [b, n, 1]).
    b, n = 2, 8
    preds = jax.random.normal(k1, (b, n, 2), dtype=jnp.float32) * 2.0
    targets = jax.random.normal(k2, (b, n, 2), dtype=jnp.float32) * 2.0
    weights = (jax.random.uniform(k3, (b, n, 1)) > 0.3).astype(jnp.float32)

    loss = smooth_l1_loss(preds, targets, weights)
    jax.block_until_ready(loss)
    ref = _smooth_l1_loss_ref(preds, targets, weights)
    assert jnp.allclose(loss, ref, rtol=1e-5, atol=1e-6), (loss, ref)

    # Ragged case with a tiny tile so the multi-step accumulator path
    # (grid > 1) and the zero-padding logic are both exercised.
    b2, n2 = 3, 555
    preds2 = jax.random.normal(k4, (b2, n2, 2), dtype=jnp.float32) * 3.0
    targets2 = jax.random.normal(k5, (b2, n2, 2), dtype=jnp.float32) * 3.0
    weights2 = (jax.random.uniform(k6, (b2, n2, 1)) > 0.5).astype(jnp.float32)

    loss2 = smooth_l1_loss(preds2, targets2, weights2,
                           block_rows=8, block_cols=128)
    jax.block_until_ready(loss2)
    ref2 = _smooth_l1_loss_ref(preds2, targets2, weights2)
    assert jnp.allclose(loss2, ref2, rtol=1e-4, atol=1e-6), (loss2, ref2)

    print("KERNEL_OK")
</pallas_src>

<mosaic_0001>
module attributes {stable_mosaic.version = 11 : i64} {
  func.func @_smooth_l1_kernel(%arg0: i32, %arg1: memref<8x1024xf32, #tpu.memory_space<vmem>>, %arg2: memref<8x1024xf32, #tpu.memory_space<vmem>>, %arg3: memref<8x1024xf32, #tpu.memory_space<vmem>>, %arg4: memref<1x1xf32, #tpu.memory_space<vmem>>, %arg5: memref<1x1xf32, #tpu.memory_space<vmem>>, %arg6: memref<1x1xf32, #tpu.memory_space<vmem>>) attributes {dimension_semantics = [#tpu.dimension_semantics<arbitrary>], iteration_bounds = array<i64: 1>, scalar_prefetch = 0 : i64, scratch_operands = 2 : i64, tpu.core_type = #tpu.core_type<tc>, window_params = [{transform_indices = @transform_0, window_bounds = array<i64: 8, 1024>}, {transform_indices = @transform_1, window_bounds = array<i64: 8, 1024>}, {transform_indices = @transform_2, window_bounds = array<i64: 8, 1024>}, {pipeline_mode = #tpu.pipeline_mode<synchronous>, transform_indices = @transform_3, window_bounds = array<i64: 1, 1>}]} {
    %c0_i32 = arith.constant 0 : i32
    %0 = arith.cmpi eq, %arg0, %c0_i32 : i32
    %1 = arith.extui %0 : i1 to i32
    %c0_i32_0 = arith.constant 0 : i32
    %2 = arith.cmpi ne, %1, %c0_i32_0 : i32
    scf.if %2 {
      %cst_19 = arith.constant 0.000000e+00 : f32
      %34 = vector.broadcast %cst_19 : f32 to vector<1x1xf32>
      %c0_20 = arith.constant 0 : index
      %c0_21 = arith.constant 0 : index
      %35 = vector.load %arg5[%c0_20, %c0_21] : memref<1x1xf32, #tpu.memory_space<vmem>>, vector<1x1xf32>
      tpu.vector_store %arg5[%c0_20, %c0_21], %34 {strides = array<i32>} : memref<1x1xf32, #tpu.memory_space<vmem>>, vector<1x1xf32>,
      %cst_22 = arith.constant 0.000000e+00 : f32
      %36 = vector.broadcast %cst_22 : f32 to vector<1x1xf32>
      %c0_23 = arith.constant 0 : index
      %c0_24 = arith.constant 0 : index
      %37 = vector.load %arg6[%c0_23, %c0_24] : memref<1x1xf32, #tpu.memory_space<vmem>>, vector<1x1xf32>
      tpu.vector_store %arg6[%c0_23, %c0_24], %36 {strides = array<i32>} : memref<1x1xf32, #tpu.memory_space<vmem>>, vector<1x1xf32>,
    } else {
    }
    %c0 = arith.constant 0 : index
    %c0_1 = arith.constant 0 : index
    %3 = vector.load %arg1[%c0, %c0_1] : memref<8x1024xf32, #tpu.memory_space<vmem>>, vector<8x1024xf32>
    %c0_2 = arith.constant 0 : index
    %c0_3 = arith.constant 0 : index
    %4 = vector.load %arg2[%c0_2, %c0_3] : memref<8x1024xf32, #tpu.memory_space<vmem>>, vector<8x1024xf32>
    %c0_4 = arith.constant 0 : index
    %c0_5 = arith.constant 0 : index
    %5 = vector.load %arg3[%c0_4, %c0_5] : memref<8x1024xf32, #tpu.memory_space<vmem>>, vector<8x1024xf32>
    %6 = arith.subf %3, %4 : vector<8x1024xf32>
    %7 = math.absf %6 : vector<8x1024xf32>
    %cst = arith.constant 1.000000e+00 : f32
    %8 = vector.broadcast %cst : f32 to vector<8x1024xf32>
    %9 = arith.cmpf olt, %7, %8 : vector<8x1024xf32>
    %10 = arith.mulf %7, %7 : vector<8x1024xf32>
    %cst_6 = arith.constant 5.000000e-01 : f32
    %11 = vector.broadcast %cst_6 : f32 to vector<8x1024xf32>
    %12 = arith.subf %7, %11 : vector<8x1024xf32>
    %13 = arith.select %9, %10, %12 : vector<8x1024xi1>, vector<8x1024xf32>
    %c0_7 = arith.constant 0 : index
    %c0_8 = arith.constant 0 : index
    %14 = vector.load %arg5[%c0_7, %c0_8] : memref<1x1xf32, #tpu.memory_space<vmem>>, vector<1x1xf32>
    %15 = arith.mulf %13, %5 : vector<8x1024xf32>
    %16 = vector.shape_cast %15 : vector<8x1024xf32> to vector<1x8x1024xf32>
    %cst_9 = arith.constant dense<0.000000e+00> : vector<1xf32>
    %17 = vector.multi_reduction <add>, %16, %cst_9 [1, 2] : vector<1x8x1024xf32> to vector<1xf32>
    %18 = vector.shape_cast %17 : vector<1xf32> to vector<1x1x1xf32>
    %19 = vector.extract %18[0, 0, 0] : f32 from vector<1x1x1xf32>
    %20 = vector.broadcast %19 : f32 to vector<1x1xf32>
    %21 = arith.addf %14, %20 : vector<1x1xf32>
    %c0_10 = arith.constant 0 : index
    %c0_11 = arith.constant 0 : index
    %22 = vector.load %arg5[%c0_10, %c0_11] : memref<1x1xf32, #tpu.memory_space<vmem>>, vector<1x1xf32>
    tpu.vector_store %arg5[%c0_10, %c0_11], %21 {strides = array<i32>} : memref<1x1xf32, #tpu.memory_space<vmem>>, vector<1x1xf32>,
    %c0_12 = arith.constant 0 : index
    %c0_13 = arith.constant 0 : index
    %23 = vector.load %arg6[%c0_12, %c0_13] : memref<1x1xf32, #tpu.memory_space<vmem>>, vector<1x1xf32>
    %24 = vector.shape_cast %5 : vector<8x1024xf32> to vector<1x8x1024xf32>
    %cst_14 = arith.constant dense<0.000000e+00> : vector<1xf32>
    %25 = vector.multi_reduction <add>, %24, %cst_14 [1, 2] : vector<1x8x1024xf32> to vector<1xf32>
    %26 = vector.shape_cast %25 : vector<1xf32> to vector<1x1x1xf32>
    %27 = vector.extract %26[0, 0, 0] : f32 from vector<1x1x1xf32>
    %28 = vector.broadcast %27 : f32 to vector<1x1xf32>
    %29 = arith.addf %23, %28 : vector<1x1xf32>
    %c0_15 = arith.constant 0 : index
    %c0_16 = arith.constant 0 : index
    %30 = vector.load %arg6[%c0_15, %c0_16] : memref<1x1xf32, #tpu.memory_space<vmem>>, vector<1x1xf32>
    tpu.vector_store %arg6[%c0_15, %c0_16], %29 {strides = array<i32>} : memref<1x1xf32, #tpu.memory_space<vmem>>, vector<1x1xf32>,
    %c0_i32_17 = arith.constant 0 : i32
    %31 = arith.cmpi eq, %arg0, %c0_i32_17 : i32
    %32 = arith.extui %31 : i1 to i32
    %c0_i32_18 = arith.constant 0 : i32
    %33 = arith.cmpi ne, %32, %c0_i32_18 : i32
    scf.if %33 {
      %c0_19 = arith.constant 0 : index
      %c0_20 = arith.constant 0 : index
      %34 = vector.load %arg5[%c0_19, %c0_20] : memref<1x1xf32, #tpu.memory_space<vmem>>, vector<1x1xf32>
      %c0_21 = arith.constant 0 : index
      %c0_22 = arith.constant 0 : index
      %35 = vector.load %arg6[%c0_21, %c0_22] : memref<1x1xf32, #tpu.memory_space<vmem>>, vector<1x1xf32>
      %cst_23 = arith.constant 1.000000e-03 : f32
      %36 = vector.broadcast %cst_23 : f32 to vector<1x1xf32>
      %37 = arith.addf %35, %36 : vector<1x1xf32>
      %38 = arith.divf %34, %37 : vector<1x1xf32>
      %c0_24 = arith.constant 0 : index
      %c0_25 = arith.constant 0 : index
      %39 = vector.load %arg4[%c0_24, %c0_25] : memref<1x1xf32, #tpu.memory_space<vmem>>, vector<1x1xf32>
      tpu.vector_store %arg4[%c0_24, %c0_25], %38 {strides = array<i32>} : memref<1x1xf32, #tpu.memory_space<vmem>>, vector<1x1xf32>,
    } else {
    }
    return
  }
  func.func @transform_0(%arg0: i32) -> (i32, i32) {
    %c0_i32 = arith.constant 0 : i32
    %c0_i32_0 = arith.constant 0 : i32
    return %arg0, %c0_i32 : i32, i32
  }
  func.func @transform_1(%arg0: i32) -> (i32, i32) {
    %c0_i32 = arith.constant 0 : i32
    %c0_i32_0 = arith.constant 0 : i32
    return %arg0, %c0_i32 : i32, i32
  }
  func.func @transform_2(%arg0: i32) -> (i32, i32) {
    %c0_i32 = arith.constant 0 : i32
    %c0_i32_0 = arith.constant 0 : i32
    return %arg0, %c0_i32 : i32, i32
  }
  func.func @transform_3(%arg0: i32) -> (i32, i32) {
    %c0_i32 = arith.constant 0 : i32
    %c0_i32_0 = arith.constant 0 : i32
    %c0_i32_1 = arith.constant 0 : i32
    return %c0_i32, %c0_i32_0 : i32, i32
  }
}

</mosaic_0001>

<bundles_post_ra>
// kernel: tpu_custom_call.1
= control target key start
LH: loop header
LB: loop body
LE: loop exit
PB: predicated region body
PF: predicated region fallthrough
CT: control target
= control target key end

     0   :  { %8 = vsyncpa [#allocation5], 0  ;;  %s351_s0 = inlined_call_operand.hbm [shape: f32[8,1024], index: 0, kind: input, shape index: {}]   ;;  %s352_s1 = inlined_call_operand.hbm [shape: f32[8,1024], index: 1, kind: input, shape index: {}]   ;;  %s353_s2 = inlined_call_operand.hbm [shape: f32[8,1024], index: 2, kind: input, shape index: {}]   ;;  %s354_s3 = inlined_call_operand.hbm [shape: f32[1,1], index: 3, kind: output, shape index: {}]  }
   0x1   :  { %9 = vsyncpa [#allocation8], 0 }
   0x2   :  { %10 = vsyncpa [#allocation6], 0  ;;  %s308_s12 = smov [#allocation7]   ;;  %s309_s14 = smov [#allocation4]  }
   0x3   :  { %s27_s13 = sshll.u32 %s308_s12, 4  ;;  %s17_s15 = sshll.u32 %s309_s14, 4  ;;  %s28_s13 = int_to_ptr.vmem [resolvable:$true] %s27_s13  ;;  %s18_s15 = int_to_ptr.vmem [resolvable:$true] %s17_s15 }
   0x4   :  { %s230_s16 = scalar_lea.vmem %s28_s13, 1024  ;;  %p235_p1 = scmp.lt.s32.totalorder %s28_s13, %s28_s13 }
   0x5   :  { %p231_p0 = scmp.ne.s32.totalorder %s28_s13, %s230_s16  ;;  %p236_p2 = scmp.lt.s32.totalorder %s230_s16, %s230_s16 }
   0x7   :  { %p237_p3 = por %p236_p2, %p235_p1 }
   0x9   :  { %p238_p4 = pnand %p237_p3, %p231_p0 }
   0xb   :  { %241 = shalt.err (!%p238_p4)
}
   0xc   :  { %30 = dma.hbm_to_vmem [thread:$0]  %s352_s1, 1024, %s28_s13, [#allocation8]  }
   0xd   :  { %s250_s19 = scalar_lea.vmem %s18_s15, 1024  ;;  %p255_p6 = scmp.lt.s32.totalorder %s18_s15, %s18_s15 }
   0xe   :  { %p251_p5 = scmp.ne.s32.totalorder %s18_s15, %s250_s19  ;;  %p256_p7 = scmp.lt.s32.totalorder %s250_s19, %s250_s19 }
  0x10   :  { %p257_p8 = por %p256_p7, %p255_p6 }
  0x12   :  { %p258_p9 = pnand %p257_p8, %p251_p5 }
  0x14   :  { %261 = shalt.err (!%p258_p9)
}
  0x15   :  { %20 = dma.hbm_to_vmem [thread:$0]  %s351_s0, 1024, %s18_s15, [#allocation5]  }
  0x16   :  { %s310_s22 = smov [#allocation9]  }
  0x17   :  { %s37_s23 = sshll.u32 %s310_s22, 4  ;;  %s38_s23 = int_to_ptr.vmem [resolvable:$true] %s37_s23 }
  0x18   :  { %s270_s24 = scalar_lea.vmem %s38_s23, 1024  ;;  %p275_p11 = scmp.lt.s32.totalorder %s38_s23, %s38_s23 }
  0x19   :  { %p271_p10 = scmp.ne.s32.totalorder %s38_s23, %s270_s24  ;;  %p276_p12 = scmp.lt.s32.totalorder %s270_s24, %s270_s24 }
  0x1b   :  { %p277_p13 = por %p276_p12, %p275_p11 }
  0x1d   :  { %p278_p0 = pnand %p277_p13, %p271_p10 }
  0x1f   :  { %281 = shalt.err (!%p278_p0)
}
  0x20   :  { %40 = dma.hbm_to_vmem [thread:$0]  %s353_s2, 1024, %s38_s23, [#allocation8]  }
  0x21   :  { %302 = dma.done.wait [#allocation5], 1024  }
  0x22   :  { %303 = vsyncadd [#allocation5], 4294966272 }
  0x23   :  { %304 = dma.done.wait [#allocation8], 2048  }
  0x24   :  { %305 = vsyncadd [#allocation8], 4294965248  ;;  %v57_v0 = vld [vmem:[#allocation4] sm:$0xff]  ;;  %v58_v1 = vld [vmem:[#allocation4 + $0x8] sm:$0xff]  ;;  %vm54_vm8 = vcmask 0   ;;  %s312_s26 = smov [#allocation10]  }
  0x25   :  { %v59_v2 = vld [vmem:[#allocation4 + $0x10] sm:$0xff]  ;;  %v60_v3 = vld [vmem:[#allocation4 + $0x18] sm:$0xff]  ;;  %v61_v4 = vld [vmem:[#allocation4 + $0x20] sm:$0xff]  ;;  %s193_s27 = sshll.u32 %s312_s26, 4  ;;  %s194_s27 = int_to_ptr.vmem [resolvable:$true] %s193_s27 }
  0x26   :  { %v65_v5 = vld [vmem:[#allocation7] sm:$0xff]  ;;  %v66_v6 = vld [vmem:[#allocation7 + $0x8] sm:$0xff]  ;;  %v67_v7 = vld [vmem:[#allocation7 + $0x10] sm:$0xff]  ;;  %s282_s28 = scalar_lea.vmem %s194_s27, 16  ;;  %s286_s29 = scalar_lea.vmem %s194_s27, 32 }
  0x27   :  { %v68_v8 = vld [vmem:[#allocation7 + $0x18] sm:$0xff]  ;;  %v81_v9 = vsub.f32 %v57_v0, %v65_v5  ;;  %v62_v10 = vld [vmem:[#allocation4 + $0x28] sm:$0xff]  ;;  %v69_v11 = vld [vmem:[#allocation7 + $0x20] sm:$0xff]  ;;  %v82_v13 = vsub.f32 %v58_v1, %v66_v6  ;;  %v83_v14 = vsub.f32 %v59_v2, %v67_v7  ;;  %p283_p1 = scmp.ne.s32.totalorder %s194_s27, %s282_s28  ;;  %p287_p2 = scmp.lt.s32.totalorder %s194_s27, %s194_s27 }
  0x28   :  { %v70_v12 = vld [vmem:[#allocation7 + $0x28] sm:$0xff]  ;;  %v84_v15 = vsub.f32 %v60_v3, %v68_v8  ;;  %v63_v16 = vld [vmem:[#allocation4 + $0x30] sm:$0xff]  ;;  %v85_v18 = vsub.f32 %v61_v4, %v69_v11  ;;  %v64_v20 = vld [vmem:[#allocation4 + $0x38] sm:$0xff]  ;;  %p288_p3 = scmp.lt.s32.totalorder %s286_s29, %s282_s28 }
  0x29   :  { %v71_v17 = vld [vmem:[#allocation7 + $0x30] sm:$0xff]  ;;  %v89_v19 = vand.u32 2147483647, %v81_v9  ;;  %v72_v21 = vld [vmem:[#allocation7 + $0x38] sm:$0xff]  ;;  %v86_v22 = vsub.f32 %v62_v10, %v70_v12  ;;  %v90_v23 = vand.u32 2147483647, %v82_v13 }
  0x2a   :  { %v91_v24 = vand.u32 2147483647, %v83_v14  ;;  %v92_v25 = vand.u32 2147483647, %v84_v15  ;;  %v73_v26 = vld [vmem:[#allocation9] sm:$0xff]  ;;  %v74_v27 = vld [vmem:[#allocation9 + $0x8] sm:$0xff]  ;;  %v87_v28 = vsub.f32 %v63_v16, %v71_v17  ;;  %v88_v29 = vsub.f32 %v64_v20, %v72_v21  ;;  %p289_p4 = por %p288_p3, %p287_p2 }
  0x2b   :  { %v93_v30 = vand.u32 2147483647, %v85_v18  ;;  %v105_v31 = vmul.f32 %v89_v19, %v89_v19  ;;  %v159_v32 = vadd.f32 %v74_v27, %v73_v26  ;;  %v94_v33 = vand.u32 2147483647, %v86_v22  ;;  %v75_v41 = vld [vmem:[#allocation9 + $0x10] sm:$0xff]  ;;  %v76_v49 = vld [vmem:[#allocation9 + $0x18] sm:$0xff] }
  0x2c   :  { %vm97_vm0 = vcmp.lt.f32.partialorder %v89_v19, 1.0  ;;  %v106_v34 = vmul.f32 %v90_v23, %v90_v23  ;;  %v107_v35 = vmul.f32 %v91_v24, %v91_v24  ;;  %vm98_vm1 = vcmp.lt.f32.partialorder %v90_v23, 1.0  ;;  %v77_v56 = vld [vmem:[#allocation9 + $0x20] sm:$0xff]  ;;  %v78_v63 = vld [vmem:[#allocation9 + $0x28] sm:$0xff]  ;;  %v79_v6 = vld [vmem:[#allocation9 + $0x30] sm:$0xff]  ;;  %p290_p5 = pnand %p289_p4, %p283_p1 }
  0x2d   :  { %vm99_vm2 = vcmp.lt.f32.partialorder %v91_v24, 1.0  ;;  %v108_v36 = vmul.f32 %v92_v25, %v92_v25  ;;  %v203_v37 = vadd.f32 -0.5, %v89_v19  ;;  %vm100_vm3 = vcmp.lt.f32.partialorder %v92_v25, 1.0  ;;  %v80_v11 = vld [vmem:[#allocation9 + $0x38] sm:$0xff] }
  0x2e   :  { %v204_v38 = vadd.f32 -0.5, %v90_v23  ;;  %v205_v39 = vadd.f32 -0.5, %v91_v24  ;;  %v206_v40 = vadd.f32 -0.5, %v92_v25  ;;  %v95_v42 = vand.u32 2147483647, %v87_v28 }
  0x2f   :  { %v109_v43 = vmul.f32 %v93_v30, %v93_v30  ;;  %v207_v44 = vadd.f32 -0.5, %v93_v30  ;;  %v121_v45 = vsel %vm97_vm0, %v105_v31, %v203_v37  ;;  %v96_v46 = vand.u32 2147483647, %v88_v29 }
  0x30   :  { %vm101_vm4 = vcmp.lt.f32.partialorder %v93_v30, 1.0  ;;  %v122_v47 = vsel %vm98_vm1, %v106_v34, %v204_v38  ;;  %v123_v48 = vsel %vm99_vm2, %v107_v35, %v205_v39  ;;  %v110_v50 = vmul.f32 %v94_v33, %v94_v33 }
  0x31   :  { %v208_v51 = vadd.f32 -0.5, %v94_v33  ;;  %v124_v52 = vsel %vm100_vm3, %v108_v36, %v206_v40  ;;  %v130_v53 = vmul.f32 %v121_v45, %v73_v26  ;;  %vm102_vm5 = vcmp.lt.f32.partialorder %v94_v33, 1.0 }
  0x32   :  { %v131_v54 = vmul.f32 %v122_v47, %v74_v27  ;;  %v132_v55 = vmul.f32 %v123_v48, %v75_v41  ;;  %v111_v57 = vmul.f32 %v95_v42, %v95_v42  ;;  %v209_v58 = vadd.f32 -0.5, %v95_v42 }
  0x33   :  { %v125_v59 = vsel %vm101_vm4, %v109_v43, %v207_v44  ;;  %v160_v60 = vadd.f32 %v159_v32, %v75_v41  ;;  %vm103_vm6 = vcmp.lt.f32.partialorder %v95_v42, 1.0  ;;  %v133_v61 = vmul.f32 %v124_v52, %v76_v49 }
  0x34   :  { %v138_v62 = vadd.f32 %v131_v54, %v130_v53  ;;  %v112_v0 = vmul.f32 %v96_v46, %v96_v46  ;;  %v210_v1 = vadd.f32 -0.5, %v96_v46  ;;  %v126_v2 = vsel %vm102_vm5, %v110_v50, %v208_v51 }
  0x35   :  { %v161_v3 = vadd.f32 %v160_v60, %v76_v49  ;;  %vm104_vm7 = vcmp.lt.f32.partialorder %v96_v46, 1.0  ;;  %v134_v4 = vmul.f32 %v125_v59, %v77_v56  ;;  %v127_v7 = vsel %vm103_vm6, %v111_v57, %v209_v58 }
  0x36   :  { %v139_v5 = vadd.f32 %v138_v62, %v132_v55  ;;  %v135_v9 = vmul.f32 %v126_v2, %v78_v63  ;;  %v128_v12 = vsel %vm104_vm7, %v112_v0, %v210_v1  ;;  %v136_v13 = vmul.f32 %v127_v7, %v79_v6 }
  0x37   :  { %v162_v8 = vadd.f32 %v161_v3, %v77_v56  ;;  %v137_v16 = vmul.f32 %v128_v12, %v80_v11  ;;  %v311_v22 = vmov 0.0  }
  0x38   :  { %v140_v10 = vadd.f32 %v139_v5, %v133_v61  ;;  %55 = vst.msk [vmem:[#allocation2] sm:$0x1] %vm54_vm8, %v311_v22  ;;  %56 = vst.msk [vmem:[#allocation3] sm:$0x1] %vm54_vm8, %v311_v22 }
  0x39   :  { %v163_v15 = vadd.f32 %v162_v8, %v78_v63 }
  0x3a   :  { %v141_v14 = vadd.f32 %v140_v10, %v134_v4 }
  0x3b   :  { %v164_v19 = vadd.f32 %v163_v15, %v79_v6 }
  0x3c   :  { %v142_v17 = vadd.f32 %v141_v14, %v135_v9 }
  0x3d   :  { %v165_v21 = vadd.f32 %v164_v19, %v80_v11 }
  0x3e   :  { %v143_v18 = vadd.f32 %v142_v17, %v136_v13 }
  0x3f   :  { %v129_v37 = vld [vmem:[#allocation2] sm:$0x1]  ;;  %v158_v40 = vld [vmem:[#allocation3] sm:$0x1] }
  0x40   :  { %v144_v20 = vadd.f32 %v143_v18, %v137_v16 }
  0x42   :  { %145 = vadd.xlane.f32.xlu0 %v144_v20 }
  0x46   :  { %166 = vadd.xlane.f32.xlu0 %v165_v21 }
  0xcb   :  { %v146_v23 = vpop.xlane.xlu0 %145 }
  0xcc   :  { %v147_v24 = vrot.slane %v146_v23, 4 }
  0xce   :  { %v148_v25 = vadd.f32 %v147_v24, %v146_v23 }
  0xcf   :  { %v167_v26 = vpop.xlane.xlu0 %166 }
  0xd0   :  { %v149_v27 = vrot.slane %v148_v25, 2  ;;  %v168_v28 = vrot.slane %v167_v26, 4 }
  0xd2   :  { %v169_v29 = vadd.f32 %v168_v28, %v167_v26  ;;  %v150_v30 = vadd.f32 %v149_v27, %v148_v25 }
  0xd4   :  { %v170_v31 = vrot.slane %v169_v29, 2  ;;  %v151_v32 = vrot.slane %v150_v30, 1 }
  0xd6   :  { %v171_v33 = vadd.f32 %v170_v31, %v169_v29  ;;  %v152_v34 = vadd.f32 %v151_v32, %v150_v30 }
  0xd8   :  { %211 = vpush %v152_v34  ;;  %v172_v35 = vrot.slane %v171_v33, 1 }
  0xda   :  { %v173_v36 = vadd.f32 %v172_v35, %v171_v33 }
  0xdc   :  { %213 = vpush %v173_v36 }
 0x109   :  { %s212_s0 = spop %211 }
 0x10a   :  { %v154_v38 = vstv %s212_s0 }
 0x10b   :  { %v155_v39 = vadd.f32 %v154_v38, %v129_v37 }
 0x10d   :  { %157 = vst.msk [vmem:[#allocation2] sm:$0x1] %vm54_vm8, %v155_v39  ;;  %s214_s2 = spop %213 }
 0x10e   :  { %v175_v41 = vstv %s214_s2 }
 0x10f   :  { %v176_v42 = vadd.f32 %v175_v41, %v158_v40 }
 0x111   :  { %177 = vst.msk [vmem:[#allocation3] sm:$0x1] %vm54_vm8, %v176_v42 }
 0x114   :  { %v181_v46 = vld [vmem:[#allocation2] sm:$0x1] }
 0x118   :  { %v182_v43 = vld [vmem:[#allocation3] sm:$0x1] }
 0x119   :  { %v183_v44 = vadd.f32 0.001, %v182_v43 }
 0x11b   :  { %220 = vrcp.f32 %v183_v44 }
 0x128   :  { %v221_v45 = vpop.eup %220 }
 0x129   :  { %v185_v47 = vmul.f32 %v221_v45, %v181_v46 }
 0x12b   :  { %186 = vst.msk [vmem:[#allocation10] sm:$0x1] %vm54_vm8, %v185_v47 }
 0x12c   :  { %293 = shalt.err (!%p290_p5)
}
 0x12d   :  { %196 = dma.vmem_to_hbm [thread:$0]  %s194_s27, 16, %s354_s3, [#allocation6]  }
 0x12e   :  { %306 = dma.done.wait [#allocation6], 16  }
 0x12f   :  { %307 = vsyncadd [#allocation6], 4294967280 }
 0x130   :  { %200 = vsyncpa [#allocation5], 1 }
 0x131   :  { %201 = vsyncpa [#allocation8], 1 }
 0x132   :  { %202 = vsyncpa [#allocation6], 1 }

</bundles_post_ra>
